<compile_context>
chip_gen: v5e
topology: v5e:2x2
jax: 0.10.0
libtpu: 0.0.40
codegen_flags: <defaults>
</compile_context>

<pallas_src>
import functools

import jax
import jax.numpy as jnp
from jax.experimental import pallas as pl
from jax.experimental.pallas import tpu as pltpu

LANE = 128      # lane width: every feature dim padded to a multiple of this


def _round_up(x, m):
    return (x + m - 1) // m * m


def _vmem_capacity_bytes():
    # v7x has 64 MiB / TensorCore (v5e/v6e: 128 MiB); query when possible and
    # otherwise assume the smallest so we never over-subscribe.
    try:
        return int(pltpu.get_tpu_info().vmem_capacity_bytes)
    except Exception:
        return 64 << 20


def _const_spec(shape, single_buffer):
    """BlockSpec for a grid-invariant (VMEM-resident) operand (weights/biases)."""
    index_map = lambda i: (0, 0)
    if single_buffer:
        try:
            # Constant index_map -> fetched once in the prologue; one buffer is enough.
            return pl.BlockSpec(shape, index_map, pipeline_mode=pl.Buffered(1))
        except (TypeError, AttributeError):
            pass
    return pl.BlockSpec(shape, index_map)


# --------------------------------------------------------------------------
# Kernel: the full MLP for one batch tile. All weights/biases live in VMEM,
# intermediate activations stay in vregs/VMEM (never written back to HBM).
# --------------------------------------------------------------------------
def _fused_mlp_kernel(x_ref, *refs, num_layers, compute_dtype):
    w_refs = refs[0:2 * num_layers:2]
    b_refs = refs[1:2 * num_layers:2]
    o_ref = refs[2 * num_layers]

    h_mxu = x_ref[...]                      # already stored in the MXU compute dtype
    h = None
    for i in range(num_layers):
        acc = jnp.dot(h_mxu, w_refs[i][...],
                      preferred_element_type=jnp.float32)   # f32 MXU accumulation
        h = acc + b_refs[i][...].astype(jnp.float32)        # bias epilogue in f32 (VPU)
        if i + 1 < num_layers:
            h = jnp.maximum(h, 0.0)                         # self.activation (ReLU)
            h_mxu = h.astype(compute_dtype)
    # final_activation is None -> no-op
    o_ref[...] = h.astype(o_ref.dtype)


# --------------------------------------------------------------------------
# One-time parameter preparation: transpose to (Din, Dout), zero-pad every
# feature dim to a multiple of 128, cast weights to the compute dtype.
# --------------------------------------------------------------------------
def prepare_mlp_params(params, compute_dtype=jnp.float32):
    """params: list of (weight (out,in), bias (out,)) in PyTorch convention."""
    dims = [params[0][0].shape[1]] + [w.shape[0] for (w, _) in params]
    pdims = [_round_up(d, LANE) for d in dims]
    prepped = []
    for i, (w, b) in enumerate(params):
        din, dout = dims[i], dims[i + 1]
        pin, pout = pdims[i], pdims[i + 1]
        w_t = jnp.zeros((pin, pout), compute_dtype)
        w_t = w_t.at[:din, :dout].set(jnp.transpose(w).astype(compute_dtype))
        b_p = jnp.zeros((1, pout), jnp.float32)
        b_p = b_p.at[:, :dout].set(b.reshape(1, -1).astype(jnp.float32))
        prepped.append((w_t, b_p))
    return prepped


# --------------------------------------------------------------------------
# Wrapper: pad batch/features, launch one fused pallas_call, slice back.
# --------------------------------------------------------------------------
def mlp_forward(x, prepped, *, out_features, block_batch=512,
                single_buffer_weights=True):
    num_layers = len(prepped)
    B, Din = x.shape
    pin0 = prepped[0][0].shape[0]
    pout_last = prepped[-1][0].shape[1]
    compute_dtype = prepped[0][0].dtype
    cbytes = jnp.dtype(compute_dtype).itemsize
    row_align = max(8, 32 // cbytes)        # 8 rows for f32 tiles, 16 for bf16

    # ---- VMEM budget & batch-tile selection --------------------------------
    wbuf = 1 if single_buffer_weights else 2
    weight_bytes = wbuf * sum(
        w.size * w.dtype.itemsize + b.size * b.dtype.itemsize
        for (w, b) in prepped)
    widest = max([pin0] + [w.shape[1] for (w, _) in prepped])
    vmem_budget = min(int(0.85 * _vmem_capacity_bytes()), 100 << 20)

    def vmem_estimate(tm):
        io_bytes = 2 * tm * pin0 * cbytes + 2 * tm * pout_last * 4  # dbl-buffered x / out
        act_bytes = 2 * 4 * tm * widest                             # live f32 h / acc temps
        return weight_bytes + io_bytes + act_bytes + (2 << 20)

    b_up = _round_up(B, row_align)
    tm = _round_up(min(block_batch, b_up), row_align)
    while tm > row_align and vmem_estimate(tm) > vmem_budget:
        tm = _round_up(max(tm // 2, row_align), row_align)
    # v7x megacore: make sure the "parallel" batch axis has >= 2 tiles when the
    # batch allows it, so work shards across both TensorCores.
    if b_up // tm < 2 and b_up >= 2 * row_align:
        tm = _round_up(pl.cdiv(b_up, 2), row_align)
    Bp = _round_up(B, tm)

    # ---- operands -----------------------------------------------------------
    # Input is built/streamed directly in the compute dtype (halves the
    # activation DMA on the bf16 path; identical to before on the f32 path).
    x_p = jnp.zeros((Bp, pin0), compute_dtype)
    x_p = x_p.at[:B, :Din].set(x.astype(compute_dtype))

    in_specs = [pl.BlockSpec((tm, pin0), lambda i: (i, 0))]
    operands = [x_p]
    for (w_t, b_p) in prepped:
        in_specs.append(_const_spec(w_t.shape, single_buffer_weights))
        in_specs.append(_const_spec(b_p.shape, single_buffer_weights))
        operands.append(w_t)
        operands.append(b_p)

    kernel = functools.partial(_fused_mlp_kernel,
                               num_layers=num_layers,
                               compute_dtype=compute_dtype)

    vmem_limit = int(min(vmem_budget, max(vmem_estimate(tm), 32 << 20)))
    compiler_params = pltpu.CompilerParams(
        dimension_semantics=("parallel",),
        vmem_limit_bytes=vmem_limit)

    out_p = pl.pallas_call(
        kernel,
        out_shape=jax.ShapeDtypeStruct((Bp, pout_last), jnp.float32),
        grid_spec=pltpu.PrefetchScalarGridSpec(
            num_scalar_prefetch=0,
            grid=(Bp // tm,),
            in_specs=in_specs,
            out_specs=pl.BlockSpec((tm, pout_last), lambda i: (i, 0)),
        ),
        compiler_params=compiler_params,
    )(*operands)

    return out_p[:B, :out_features]


# --------------------------------------------------------------------------
# Reference / param init (mirrors init_xavier: xavier-uniform W, zero bias)
# --------------------------------------------------------------------------
def init_mlp_params(key, in_features, hidden_features, out_features):
    dims = [in_features] + list(hidden_features) + [out_features]
    params = []
    for i in range(len(dims) - 1):
        fan_in, fan_out = dims[i], dims[i + 1]
        key, sub = jax.random.split(key)
        limit = (6.0 / (fan_in + fan_out)) ** 0.5
        w = jax.random.uniform(sub, (fan_out, fan_in), jnp.float32,
                               minval=-limit, maxval=limit)
        b = jnp.zeros((fan_out,), jnp.float32)
        params.append((w, b))
    return params


def mlp_reference(x, params):
    for i, (w, b) in enumerate(params):
        if i > 0:
            x = jnp.maximum(x, 0.0)
        x = x @ w.T + b
    return x


if __name__ == "__main__":
    key = jax.random.PRNGKey(0)
    key, xkey = jax.random.split(key)

    in_features, hidden_features, out_features = 32, [64, 48], 16
    batch = 8

    x = jax.random.normal(xkey, (batch, in_features), jnp.float32)
    params = init_mlp_params(key, in_features, hidden_features, out_features)
    ref = mlp_reference(x, params)

    def run(prepped, single_buffer):
        fwd = jax.jit(functools.partial(mlp_forward, out_features=out_features,
                                        single_buffer_weights=single_buffer))
        return jax.block_until_ready(fwd(x, prepped))

    # --- f32 compute path (tight tolerance) ---
    # Prefer single-buffered resident weights; fall back to default double
    # buffering if this jax/Mosaic build rejects Buffered(1).
    prepped_f32 = prepare_mlp_params(params, compute_dtype=jnp.float32)
    try:
        out_f32 = run(prepped_f32, True)
        single_buffer = True
    except Exception:
        out_f32 = run(prepped_f32, False)
        single_buffer = False
    assert out_f32.shape == (batch, out_features)
    assert jnp.allclose(out_f32, ref, atol=1e-5, rtol=1e-5), "f32 mismatch vs reference"

    # --- bf16 compute path (recommended on v5e/v6e/v7x: bf16 MXU, f32 accumulation,
    #     bf16 activation DMA), loose tolerance ---
    prepped_bf16 = prepare_mlp_params(params, compute_dtype=jnp.bfloat16)
    out_bf16 = run(prepped_bf16, single_buffer)
    assert out_bf16.shape == (batch, out_features)
    assert jnp.allclose(out_bf16, ref, atol=1e-1, rtol=5e-2), "bf16 mismatch vs reference"

    print("KERNEL_OK")
</pallas_src>

<mosaic_0001>
module attributes {stable_mosaic.version = 11 : i64} {
  func.func @_fused_mlp_kernel(%arg0: i32, %arg1: memref<8x128xf32, #tpu.memory_space<vmem>>, %arg2: memref<128x128xf32, #tpu.memory_space<vmem>>, %arg3: memref<1x128xf32, #tpu.memory_space<vmem>>, %arg4: memref<128x128xf32, #tpu.memory_space<vmem>>, %arg5: memref<1x128xf32, #tpu.memory_space<vmem>>, %arg6: memref<128x128xf32, #tpu.memory_space<vmem>>, %arg7: memref<1x128xf32, #tpu.memory_space<vmem>>, %arg8: memref<8x128xf32, #tpu.memory_space<vmem>>) attributes {dimension_semantics = [#tpu.dimension_semantics<parallel>], iteration_bounds = array<i64: 1>, scalar_prefetch = 0 : i64, scratch_operands = 0 : i64, tpu.core_type = #tpu.core_type<tc>, window_params = [{transform_indices = @transform_0, window_bounds = array<i64: 8, 128>}, {pipeline_mode = #tpu.pipeline_mode<synchronous>, transform_indices = @transform_1, window_bounds = array<i64: 128, 128>}, {pipeline_mode = #tpu.pipeline_mode<synchronous>, transform_indices = @transform_2, window_bounds = array<i64: 1, 128>}, {pipeline_mode = #tpu.pipeline_mode<synchronous>, transform_indices = @transform_3, window_bounds = array<i64: 128, 128>}, {pipeline_mode = #tpu.pipeline_mode<synchronous>, transform_indices = @transform_4, window_bounds = array<i64: 1, 128>}, {pipeline_mode = #tpu.pipeline_mode<synchronous>, transform_indices = @transform_5, window_bounds = array<i64: 128, 128>}, {pipeline_mode = #tpu.pipeline_mode<synchronous>, transform_indices = @transform_6, window_bounds = array<i64: 1, 128>}, {transform_indices = @transform_7, window_bounds = array<i64: 8, 128>}]} {
    %c0 = arith.constant 0 : index
    %c0_0 = arith.constant 0 : index
    %0 = vector.load %arg1[%c0, %c0_0] : memref<8x128xf32, #tpu.memory_space<vmem>>, vector<8x128xf32>
    %c0_1 = arith.constant 0 : index
    %c0_2 = arith.constant 0 : index
    %1 = vector.load %arg2[%c0_1, %c0_2] : memref<128x128xf32, #tpu.memory_space<vmem>>, vector<128x128xf32>
    %cst = arith.constant dense<0.000000e+00> : vector<8x128xf32>
    %2 = tpu.matmul %0, %1, %cst {dimension_numbers = #tpu.dot_dimension_numbers<[1], [0], [0], [1], [0, 0, 1, 1], [], []>} : vector<8x128xf32>, vector<128x128xf32>, vector<8x128xf32> -> vector<8x128xf32>
    %c0_3 = arith.constant 0 : index
    %c0_4 = arith.constant 0 : index
    %3 = vector.load %arg3[%c0_3, %c0_4] : memref<1x128xf32, #tpu.memory_space<vmem>>, vector<1x128xf32>
    %4 = vector.broadcast %3 : vector<1x128xf32> to vector<8x128xf32>
    %5 = arith.addf %2, %4 : vector<8x128xf32>
    %cst_5 = arith.constant 0.000000e+00 : f32
    %6 = vector.broadcast %cst_5 : f32 to vector<8x128xf32>
    %7 = arith.maximumf %5, %6 : vector<8x128xf32>
    %c0_6 = arith.constant 0 : index
    %c0_7 = arith.constant 0 : index
    %8 = vector.load %arg4[%c0_6, %c0_7] : memref<128x128xf32, #tpu.memory_space<vmem>>, vector<128x128xf32>
    %cst_8 = arith.constant dense<0.000000e+00> : vector<8x128xf32>
    %9 = tpu.matmul %7, %8, %cst_8 {dimension_numbers = #tpu.dot_dimension_numbers<[1], [0], [0], [1], [0, 0, 1, 1], [], []>} : vector<8x128xf32>, vector<128x128xf32>, vector<8x128xf32> -> vector<8x128xf32>
    %c0_9 = arith.constant 0 : index
    %c0_10 = arith.constant 0 : index
    %10 = vector.load %arg5[%c0_9, %c0_10] : memref<1x128xf32, #tpu.memory_space<vmem>>, vector<1x128xf32>
    %11 = vector.broadcast %10 : vector<1x128xf32> to vector<8x128xf32>
    %12 = arith.addf %9, %11 : vector<8x128xf32>
    %cst_11 = arith.constant 0.000000e+00 : f32
    %13 = vector.broadcast %cst_11 : f32 to vector<8x128xf32>
    %14 = arith.maximumf %12, %13 : vector<8x128xf32>
    %c0_12 = arith.constant 0 : index
    %c0_13 = arith.constant 0 : index
    %15 = vector.load %arg6[%c0_12, %c0_13] : memref<128x128xf32, #tpu.memory_space<vmem>>, vector<128x128xf32>
    %cst_14 = arith.constant dense<0.000000e+00> : vector<8x128xf32>
    %16 = tpu.matmul %14, %15, %cst_14 {dimension_numbers = #tpu.dot_dimension_numbers<[1], [0], [0], [1], [0, 0, 1, 1], [], []>} : vector<8x128xf32>, vector<128x128xf32>, vector<8x128xf32> -> vector<8x128xf32>
    %c0_15 = arith.constant 0 : index
    %c0_16 = arith.constant 0 : index
    %17 = vector.load %arg7[%c0_15, %c0_16] : memref<1x128xf32, #tpu.memory_space<vmem>>, vector<1x128xf32>
    %18 = vector.broadcast %17 : vector<1x128xf32> to vector<8x128xf32>
    %19 = arith.addf %16, %18 : vector<8x128xf32>
    %c0_17 = arith.constant 0 : index
    %c0_18 = arith.constant 0 : index
    %20 = vector.load %arg8[%c0_17, %c0_18] : memref<8x128xf32, #tpu.memory_space<vmem>>, vector<8x128xf32>
    tpu.vector_store %arg8[%c0_17, %c0_18], %19 {strides = array<i32>} : memref<8x128xf32, #tpu.memory_space<vmem>>, vector<8x128xf32>,
    return
  }
  func.func @transform_0(%arg0: i32) -> (i32, i32) {
    %c0_i32 = arith.constant 0 : i32
    %c0_i32_0 = arith.constant 0 : i32
    return %arg0, %c0_i32 : i32, i32
  }
  func.func @transform_1(%arg0: i32) -> (i32, i32) {
    %c0_i32 = arith.constant 0 : i32
    %c0_i32_0 = arith.constant 0 : i32
    %c0_i32_1 = arith.constant 0 : i32
    return %c0_i32, %c0_i32_0 : i32, i32
  }
  func.func @transform_2(%arg0: i32) -> (i32, i32) {
    %c0_i32 = arith.constant 0 : i32
    %c0_i32_0 = arith.constant 0 : i32
    %c0_i32_1 = arith.constant 0 : i32
    return %c0_i32, %c0_i32_0 : i32, i32
  }
  func.func @transform_3(%arg0: i32) -> (i32, i32) {
    %c0_i32 = arith.constant 0 : i32
    %c0_i32_0 = arith.constant 0 : i32
    %c0_i32_1 = arith.constant 0 : i32
    return %c0_i32, %c0_i32_0 : i32, i32
  }
  func.func @transform_4(%arg0: i32) -> (i32, i32) {
    %c0_i32 = arith.constant 0 : i32
    %c0_i32_0 = arith.constant 0 : i32
    %c0_i32_1 = arith.constant 0 : i32
    return %c0_i32, %c0_i32_0 : i32, i32
  }
  func.func @transform_5(%arg0: i32) -> (i32, i32) {
    %c0_i32 = arith.constant 0 : i32
    %c0_i32_0 = arith.constant 0 : i32
    %c0_i32_1 = arith.constant 0 : i32
    return %c0_i32, %c0_i32_0 : i32, i32
  }
  func.func @transform_6(%arg0: i32) -> (i32, i32) {
    %c0_i32 = arith.constant 0 : i32
    %c0_i32_0 = arith.constant 0 : i32
    %c0_i32_1 = arith.constant 0 : i32
    return %c0_i32, %c0_i32_0 : i32, i32
  }
  func.func @transform_7(%arg0: i32) -> (i32, i32) {
    %c0_i32 = arith.constant 0 : i32
    %c0_i32_0 = arith.constant 0 : i32
    return %arg0, %c0_i32 : i32, i32
  }
}

module attributes {stable_mosaic.version = 11 : i64} {
  func.func @_fused_mlp_kernel(%arg0: i32, %arg1: memref<8x128xf32, #tpu.memory_space<vmem>>, %arg2: memref<128x128xf32, #tpu.memory_space<vmem>>, %arg3: memref<1x128xf32, #tpu.memory_space<vmem>>, %arg4: memref<128x128xf32, #tpu.memory_space<vmem>>, %arg5: memref<1x128xf32, #tpu.memory_space<vmem>>, %arg6: memref<128x128xf32, #tpu.memory_space<vmem>>, %arg7: memref<1x128xf32, #tpu.memory_space<vmem>>, %arg8: memref<8x128xf32, #tpu.memory_space<vmem>>) attributes {dimension_semantics = [#tpu.dimension_semantics<parallel>], iteration_bounds = array<i64: 1>, scalar_prefetch = 0 : i64, scratch_operands = 0 : i64, tpu.core_type = #tpu.core_type<tc>, window_params = [{transform_indices = @transform_0, window_bounds = array<i64: 8, 128>}, {pipeline_mode = #tpu.pipeline_mode<synchronous>, transform_indices = @transform_1, window_bounds = array<i64: 128, 128>}, {pipeline_mode = #tpu.pipeline_mode<synchronous>, transform_indices = @transform_2, window_bounds = array<i64: 1, 128>}, {pipeline_mode = #tpu.pipeline_mode<synchronous>, transform_indices = @transform_3, window_bounds = array<i64: 128, 128>}, {pipeline_mode = #tpu.pipeline_mode<synchronous>, transform_indices = @transform_4, window_bounds = array<i64: 1, 128>}, {pipeline_mode = #tpu.pipeline_mode<synchronous>, transform_indices = @transform_5, window_bounds = array<i64: 128, 128>}, {pipeline_mode = #tpu.pipeline_mode<synchronous>, transform_indices = @transform_6, window_bounds = array<i64: 1, 128>}, {transform_indices = @transform_7, window_bounds = array<i64: 8, 128>}]} {
    %c0 = arith.constant 0 : index
    %c0_0 = arith.constant 0 : index
    %0 = vector.load %arg1[%c0, %c0_0] : memref<8x128xf32, #tpu.memory_space<vmem>>, vector<8x128xf32>
    %c0_1 = arith.constant 0 : index
    %c0_2 = arith.constant 0 : index
    %1 = vector.load %arg2[%c0_1, %c0_2] : memref<128x128xf32, #tpu.memory_space<vmem>>, vector<128x128xf32>
    %cst = arith.constant dense<0.000000e+00> : vector<8x128xf32>
    %2 = tpu.matmul %0, %1, %cst {dimension_numbers = #tpu.dot_dimension_numbers<[1], [0], [0], [1], [0, 0, 1, 1], [], []>} : vector<8x128xf32>, vector<128x128xf32>, vector<8x128xf32> -> vector<8x128xf32>
    %c0_3 = arith.constant 0 : index
    %c0_4 = arith.constant 0 : index
    %3 = vector.load %arg3[%c0_3, %c0_4] : memref<1x128xf32, #tpu.memory_space<vmem>>, vector<1x128xf32>
    %4 = vector.broadcast %3 : vector<1x128xf32> to vector<8x128xf32>
    %5 = arith.addf %2, %4 : vector<8x128xf32>
    %cst_5 = arith.constant 0.000000e+00 : f32
    %6 = vector.broadcast %cst_5 : f32 to vector<8x128xf32>
    %7 = arith.maximumf %5, %6 : vector<8x128xf32>
    %c0_6 = arith.constant 0 : index
    %c0_7 = arith.constant 0 : index
    %8 = vector.load %arg4[%c0_6, %c0_7] : memref<128x128xf32, #tpu.memory_space<vmem>>, vector<128x128xf32>
    %cst_8 = arith.constant dense<0.000000e+00> : vector<8x128xf32>
    %9 = tpu.matmul %7, %8, %cst_8 {dimension_numbers = #tpu.dot_dimension_numbers<[1], [0], [0], [1], [0, 0, 1, 1], [], []>} : vector<8x128xf32>, vector<128x128xf32>, vector<8x128xf32> -> vector<8x128xf32>
    %c0_9 = arith.constant 0 : index
    %c0_10 = arith.constant 0 : index
    %10 = vector.load %arg5[%c0_9, %c0_10] : memref<1x128xf32, #tpu.memory_space<vmem>>, vector<1x128xf32>
    %11 = vector.broadcast %10 : vector<1x128xf32> to vector<8x128xf32>
    %12 = arith.addf %9, %11 : vector<8x128xf32>
    %cst_11 = arith.constant 0.000000e+00 : f32
    %13 = vector.broadcast %cst_11 : f32 to vector<8x128xf32>
    %14 = arith.maximumf %12, %13 : vector<8x128xf32>
    %c0_12 = arith.constant 0 : index
    %c0_13 = arith.constant 0 : index
    %15 = vector.load %arg6[%c0_12, %c0_13] : memref<128x128xf32, #tpu.memory_space<vmem>>, vector<128x128xf32>
    %cst_14 = arith.constant dense<0.000000e+00> : vector<8x128xf32>
    %16 = tpu.matmul %14, %15, %cst_14 {dimension_numbers = #tpu.dot_dimension_numbers<[1], [0], [0], [1], [0, 0, 1, 1], [], []>} : vector<8x128xf32>, vector<128x128xf32>, vector<8x128xf32> -> vector<8x128xf32>
    %c0_15 = arith.constant 0 : index
    %c0_16 = arith.constant 0 : index
    %17 = vector.load %arg7[%c0_15, %c0_16] : memref<1x128xf32, #tpu.memory_space<vmem>>, vector<1x128xf32>
    %18 = vector.broadcast %17 : vector<1x128xf32> to vector<8x128xf32>
    %19 = arith.addf %16, %18 : vector<8x128xf32>
    %c0_17 = arith.constant 0 : index
    %c0_18 = arith.constant 0 : index
    %20 = vector.load %arg8[%c0_17, %c0_18] : memref<8x128xf32, #tpu.memory_space<vmem>>, vector<8x128xf32>
    tpu.vector_store %arg8[%c0_17, %c0_18], %19 {strides = array<i32>} : memref<8x128xf32, #tpu.memory_space<vmem>>, vector<8x128xf32>,
    return
  }
  func.func @transform_0(%arg0: i32) -> (i32, i32) {
    %c0_i32 = arith.constant 0 : i32
    %c0_i32_0 = arith.constant 0 : i32
    return %arg0, %c0_i32 : i32, i32
  }
  func.func @transform_1(%arg0: i32) -> (i32, i32) {
    %c0_i32 = arith.constant 0 : i32
    %c0_i32_0 = arith.constant 0 : i32
    %c0_i32_1 = arith.constant 0 : i32
    return %c0_i32, %c0_i32_0 : i32, i32
  }
  func.func @transform_2(%arg0: i32) -> (i32, i32) {
    %c0_i32 = arith.constant 0 : i32
    %c0_i32_0 = arith.constant 0 : i32
    %c0_i32_1 = arith.constant 0 : i32
    return %c0_i32, %c0_i32_0 : i32, i32
  }
  func.func @transform_3(%arg0: i32) -> (i32, i32) {
    %c0_i32 = arith.constant 0 : i32
    %c0_i32_0 = arith.constant 0 : i32
    %c0_i32_1 = arith.constant 0 : i32
    return %c0_i32, %c0_i32_0 : i32, i32
  }
  func.func @transform_4(%arg0: i32) -> (i32, i32) {
    %c0_i32 = arith.constant 0 : i32
    %c0_i32_0 = arith.constant 0 : i32
    %c0_i32_1 = arith.constant 0 : i32
    return %c0_i32, %c0_i32_0 : i32, i32
  }
  func.func @transform_5(%arg0: i32) -> (i32, i32) {
    %c0_i32 = arith.constant 0 : i32
    %c0_i32_0 = arith.constant 0 : i32
    %c0_i32_1 = arith.constant 0 : i32
    return %c0_i32, %c0_i32_0 : i32, i32
  }
  func.func @transform_6(%arg0: i32) -> (i32, i32) {
    %c0_i32 = arith.constant 0 : i32
    %c0_i32_0 = arith.constant 0 : i32
    %c0_i32_1 = arith.constant 0 : i32
    return %c0_i32, %c0_i32_0 : i32, i32
  }
  func.func @transform_7(%arg0: i32) -> (i32, i32) {
    %c0_i32 = arith.constant 0 : i32
    %c0_i32_0 = arith.constant 0 : i32
    return %arg0, %c0_i32 : i32, i32
  }
}

</mosaic_0001>

<bundles_post_ra>
// kernel: mlp_forward.1
= control target key start
LH: loop header
LB: loop body
LE: loop exit
PB: predicated region body
PF: predicated region fallthrough
CT: control target
= control target key end

     0   :  { %12 = vsyncpa [#allocation3], 0  ;;  %s397_s0 = inlined_call_operand.vmem [shape: f32[8,128], index: 0, kind: input, shape index: {}]   ;;  %s398_s1 = inlined_call_operand.hbm [shape: f32[128,128], index: 1, kind: input, shape index: {}]   ;;  %s399_s2 = inlined_call_operand.vmem [shape: f32[1,128], index: 2, kind: input, shape index: {}]   ;;  %s400_s3 = inlined_call_operand.hbm [shape: f32[128,128], index: 3, kind: input, shape index: {}]   ;;  %s401_s4 = inlined_call_operand.vmem [shape: f32[1,128], index: 4, kind: input, shape index: {}]   ;;  %s402_s5 = inlined_call_operand.hbm [shape: f32[128,128], index: 5, kind: input, shape index: {}]   ;;  %s403_s6 = inlined_call_operand.vmem [shape: f32[1,128], index: 6, kind: input, shape index: {}]   ;;  %s404_s7 = inlined_call_operand.hbm [shape: f32[8,128], index: 7, kind: output, shape index: {}]  }
   0x1   :  { %13 = vsyncpa [#allocation6], 0 }
   0x2   :  { %14 = vsyncpa [#allocation4], 0  ;;  %s36_s26 = sshll.u32 %s400_s3, 4  ;;  %s327_s27 = smov [#allocation5]   ;;  %s37_s26 = int_to_ptr.hbm [resolvable:$true] %s36_s26 }
   0x3   :  { %s38_s28 = sshll.u32 %s327_s27, 4  ;;  %s21_s8 = sshll.u32 %s398_s1, 4  ;;  %s39_s28 = int_to_ptr.vmem [resolvable:$true] %s38_s28  ;;  %s22_s8 = int_to_ptr.hbm [resolvable:$true] %s21_s8 }
   0x4   :  { %s328_s9 = smov 128   ;;  %s329_s10 = smov 8  }
   0x5   :  { %44 = dma.hbm_to_vmem [thread:$0]  %s37_s26, 2048, %s39_s28, [#allocation6], %s328_s9, %s328_s9, %s329_s10  }
   0x6   :  { %s330_s11 = smov [#allocation2]   ;;  %s51_s15 = sshll.u32 %s402_s5, 4  ;;  %s52_s15 = int_to_ptr.hbm [resolvable:$true] %s51_s15 }
   0x7   :  { %s23_s12 = sshll.u32 %s330_s11, 4  ;;  %s331_s3 = smov [#allocation7]   ;;  %s24_s12 = int_to_ptr.vmem [resolvable:$true] %s23_s12 }
   0x8   :  { %29 = dma.hbm_to_vmem [thread:$0]  %s22_s8, 2048, %s24_s12, [#allocation3], %s328_s9, %s328_s9, %s329_s10  }
   0x9   :  { %s53_s16 = sshll.u32 %s331_s3, 4  ;;  %s54_s16 = int_to_ptr.vmem [resolvable:$true] %s53_s16 }
   0xa   :  { %59 = dma.hbm_to_vmem [thread:$0]  %s52_s15, 2048, %s54_s16, [#allocation6], %s328_s9, %s328_s9, %s329_s10  }
   0xb   :  { %321 = dma.done.wait [#allocation3], 2048  }
   0xc   :  { %322 = vsyncadd [#allocation3], 4294965248 }
   0xd   :  { %323 = dma.done.wait [#allocation6], 4096  }
   0xe   :  { %324 = vsyncadd [#allocation6], 4294963200  ;;  %v90_v0 = vld [vmem:[#allocation2 + $0x78] sm:$0xff]  ;;  %v89_v1 = vld [vmem:[#allocation2 + $0x70] sm:$0xff]  ;;  %s332_s21 = smov [#allocation8]   ;;  %s205_s25 = sshll.u32 %s404_s7, 4  ;;  %s206_s25 = int_to_ptr.hbm [resolvable:$true] %s205_s25 }
   0xf   :  { %95 = vmatpush.msra.mxu0 %v90_v0  ;;  %v88_v2 = vld [vmem:[#allocation2 + $0x68] sm:$0xff]  ;;  %v87_v3 = vld [vmem:[#allocation2 + $0x60] sm:$0xff]  ;;  %v131_v4 = vld [vmem:[#allocation5 + $0x78] sm:$0xff]  ;;  %s203_s22 = sshll.u32 %s332_s21, 4  ;;  %s204_s22 = int_to_ptr.vmem [resolvable:$true] %s203_s22 }
  0x10   :  { %v86_v5 = vld [vmem:[#allocation2 + $0x58] sm:$0xff]  ;;  %136 = vmatpush.msra.mxu1 %v131_v4  ;;  %v130_v6 = vld [vmem:[#allocation5 + $0x70] sm:$0xff]  ;;  %v129_v7 = vld [vmem:[#allocation5 + $0x68] sm:$0xff] }
  0x11   :  { %96 = vmatpush.msra.mxu0 %v89_v1  ;;  %v85_v8 = vld [vmem:[#allocation2 + $0x50] sm:$0xff]  ;;  %v128_v9 = vld [vmem:[#allocation5 + $0x60] sm:$0xff]  ;;  %v84_v10 = vld [vmem:[#allocation2 + $0x48] sm:$0xff] }
  0x12   :  { %137 = vmatpush.msra.mxu1 %v130_v6  ;;  %v127_v11 = vld [vmem:[#allocation5 + $0x58] sm:$0xff]  ;;  %v83_v12 = vld [vmem:[#allocation2 + $0x40] sm:$0xff]  ;;  %v126_v13 = vld [vmem:[#allocation5 + $0x50] sm:$0xff] }
  0x13   :  { %97 = vmatpush.msra.mxu0 %v88_v2  ;;  %v82_v14 = vld [vmem:[#allocation2 + $0x38] sm:$0xff]  ;;  %v125_v15 = vld [vmem:[#allocation5 + $0x48] sm:$0xff]  ;;  %v81_v16 = vld [vmem:[#allocation2 + $0x30] sm:$0xff] }
  0x14   :  { %138 = vmatpush.msra.mxu1 %v129_v7  ;;  %v124_v17 = vld [vmem:[#allocation5 + $0x40] sm:$0xff]  ;;  %v80_v18 = vld [vmem:[#allocation2 + $0x28] sm:$0xff]  ;;  %v123_v19 = vld [vmem:[#allocation5 + $0x38] sm:$0xff] }
  0x15   :  { %98 = vmatpush.msra.mxu0 %v87_v3  ;;  %v79_v20 = vld [vmem:[#allocation2 + $0x20] sm:$0xff]  ;;  %v122_v21 = vld [vmem:[#allocation5 + $0x30] sm:$0xff]  ;;  %v78_v22 = vld [vmem:[#allocation2 + $0x18] sm:$0xff] }
  0x16   :  { %139 = vmatpush.msra.mxu1 %v128_v9  ;;  %v121_v23 = vld [vmem:[#allocation5 + $0x28] sm:$0xff]  ;;  %v77_v24 = vld [vmem:[#allocation2 + $0x10] sm:$0xff]  ;;  %v120_v25 = vld [vmem:[#allocation5 + $0x20] sm:$0xff] }
  0x17   :  { %99 = vmatpush.msra.mxu0 %v86_v5  ;;  %v76_v26 = vld [vmem:[#allocation2 + $0x8] sm:$0xff]  ;;  %v119_v27 = vld [vmem:[#allocation5 + $0x18] sm:$0xff]  ;;  %v75_v28 = vld [vmem:[#allocation2] sm:$0xff] }
  0x18   :  { %140 = vmatpush.msra.mxu1 %v127_v11  ;;  %v74_v29 = vld [vmem:[%s397_s0] sm:$0xff]  ;;  %v118_v30 = vld [vmem:[#allocation5 + $0x10] sm:$0xff]  ;;  %v117_v31 = vld [vmem:[#allocation5 + $0x8] sm:$0xff] }
  0x19   :  { %100 = vmatpush.msra.mxu0 %v85_v8  ;;  %v116_v32 = vld [vmem:[#allocation5] sm:$0xff]  ;;  %v172_v33 = vld [vmem:[#allocation7 + $0x78] sm:$0xff]  ;;  %v171_v34 = vld [vmem:[#allocation7 + $0x70] sm:$0xff] }
  0x1a   :  { %141 = vmatpush.msra.mxu1 %v126_v13  ;;  %177 = vmatpush.msra.mxu2 %v172_v33  ;;  %v170_v35 = vld [vmem:[#allocation7 + $0x68] sm:$0xff]  ;;  %v169_v36 = vld [vmem:[#allocation7 + $0x60] sm:$0xff]  ;;  %v168_v37 = vld [vmem:[#allocation7 + $0x58] sm:$0xff] }
  0x1b   :  { %101 = vmatpush.msra.mxu0 %v84_v10  ;;  %v167_v38 = vld [vmem:[#allocation7 + $0x50] sm:$0xff]  ;;  %v166_v39 = vld [vmem:[#allocation7 + $0x48] sm:$0xff]  ;;  %v165_v40 = vld [vmem:[#allocation7 + $0x40] sm:$0xff] }
  0x1c   :  { %142 = vmatpush.msra.mxu1 %v125_v15  ;;  %178 = vmatpush.msra.mxu2 %v171_v34  ;;  %v164_v41 = vld [vmem:[#allocation7 + $0x38] sm:$0xff]  ;;  %v163_v42 = vld [vmem:[#allocation7 + $0x30] sm:$0xff]  ;;  %v162_v43 = vld [vmem:[#allocation7 + $0x28] sm:$0xff] }
  0x1d   :  { %102 = vmatpush.msra.mxu0 %v83_v12  ;;  %v161_v44 = vld [vmem:[#allocation7 + $0x20] sm:$0xff]  ;;  %v160_v45 = vld [vmem:[#allocation7 + $0x18] sm:$0xff]  ;;  %v159_v50 = vld [vmem:[#allocation7 + $0x10] sm:$0xff] }
  0x1e   :  { %143 = vmatpush.msra.mxu1 %v124_v17  ;;  %179 = vmatpush.msra.mxu2 %v170_v35  ;;  %v222_v46 = vld [vmem:[%s399_s2] ss:$0 sm:$0xff]  ;;  %v158_v51 = vld [vmem:[#allocation7 + $0x8] sm:$0xff] }
  0x1f   :  { %103 = vmatpush.msra.mxu0 %v82_v14  ;;  %v157_v52 = vld [vmem:[#allocation7] sm:$0xff] }
  0x20   :  { %144 = vmatpush.msra.mxu1 %v123_v19  ;;  %180 = vmatpush.msra.mxu2 %v169_v36  ;;  %v223_v53 = vld [vmem:[%s401_s4] ss:$0 sm:$0xff] }
  0x21   :  { %104 = vmatpush.msra.mxu0 %v81_v16  ;;  %v224_v57 = vld [vmem:[%s403_s6] ss:$0 sm:$0xff] }
  0x22   :  { %145 = vmatpush.msra.mxu1 %v122_v21  ;;  %181 = vmatpush.msra.mxu2 %v168_v37 }
  0x23   :  { %105 = vmatpush.msra.mxu0 %v80_v18 }
  0x24   :  { %146 = vmatpush.msra.mxu1 %v121_v23  ;;  %182 = vmatpush.msra.mxu2 %v167_v38 }
  0x25   :  { %106 = vmatpush.msra.mxu0 %v79_v20 }
  0x26   :  { %147 = vmatpush.msra.mxu1 %v120_v25  ;;  %183 = vmatpush.msra.mxu2 %v166_v39 }
  0x27   :  { %107 = vmatpush.msra.mxu0 %v78_v22 }
  0x28   :  { %148 = vmatpush.msra.mxu1 %v119_v27  ;;  %184 = vmatpush.msra.mxu2 %v165_v40 }
  0x29   :  { %108 = vmatpush.msra.mxu0 %v77_v24 }
  0x2a   :  { %149 = vmatpush.msra.mxu1 %v118_v30  ;;  %185 = vmatpush.msra.mxu2 %v164_v41 }
  0x2b   :  { %109 = vmatpush.msra.mxu0 %v76_v26 }
  0x2c   :  { %150 = vmatpush.msra.mxu1 %v117_v31  ;;  %186 = vmatpush.msra.mxu2 %v163_v42 }
  0x2d   :  { %110 = vmatpush.msra.mxu0 %v75_v28 }
  0x2e   :  { %111 = vmatmul.f32.vlgmr.msra.gmra.mxu0 %v74_v29  ;;  %151 = vmatpush.msra.mxu1 %v116_v32 }
  0x2f   :  { %187 = vmatpush.msra.mxu2 %v162_v43 }
  0x31   :  { %188 = vmatpush.msra.mxu2 %v161_v44 }
  0x33   :  { %189 = vmatpush.msra.mxu2 %v160_v45 }
  0x35   :  { %190 = vmatpush.msra.mxu2 %v159_v50 }
  0x37   :  { %191 = vmatpush.msra.mxu2 %v158_v51 }
  0x39   :  { %192 = vmatpush.msra.mxu2 %v157_v52 }
  0xab   :  { %v112_v47 = vpop.f32.mrf.mxu0 }
  0xac   :  { %v113_v48 = vadd.f32 %v222_v46, %v112_v47 }
  0xae   :  { %v115_v49 = vmax.f32 %v113_v48, 0.0 }
  0xb0   :  { %152 = vmatmul.f32.vlgmr.msra.gmra.mxu1 %v115_v49 }
 0x12d   :  { %v153_v54 = vpop.f32.mrf.mxu1 }
 0x12e   :  { %v154_v55 = vadd.f32 %v223_v53, %v153_v54 }
 0x130   :  { %v156_v56 = vmax.f32 %v154_v55, 0.0 }
 0x132   :  { %193 = vmatmul.f32.vlgmr.msra.gmra.mxu2 %v156_v56 }
 0x1b5   :  { %v194_v58 = vpop.f32.mrf.mxu2 }
 0x1b6   :  { %v195_v59 = vadd.f32 %v224_v57, %v194_v58 }
 0x1b8   :  { %197 = vst [vmem:[#allocation8] sm:$0xff] %v195_v59 }
 0x1b9   :  { %208 = dma.vmem_to_hbm [thread:$0]  %s204_s22, 128, %s206_s25, [#allocation4]  }
 0x1ba   :  { %325 = dma.done.wait [#allocation4], 128  }
 0x1bb   :  { %326 = vsyncadd [#allocation4], 4294967168 }
 0x1bc   :  { %213 = vsyncpa [#allocation3], 1 }
 0x1bd   :  { %214 = vsyncpa [#allocation6], 1 }
 0x1be   :  { %215 = vsyncpa [#allocation4], 1 }

// kernel: mlp_forward.1
= control target key start
LH: loop header
LB: loop body
LE: loop exit
PB: predicated region body
PF: predicated region fallthrough
CT: control target
= control target key end

     0   :  { %12 = vsyncpa [#allocation3], 0  ;;  %s397_s0 = inlined_call_operand.vmem [shape: f32[8,128], index: 0, kind: input, shape index: {}]   ;;  %s398_s1 = inlined_call_operand.hbm [shape: f32[128,128], index: 1, kind: input, shape index: {}]   ;;  %s399_s2 = inlined_call_operand.vmem [shape: f32[1,128], index: 2, kind: input, shape index: {}]   ;;  %s400_s3 = inlined_call_operand.hbm [shape: f32[128,128], index: 3, kind: input, shape index: {}]   ;;  %s401_s4 = inlined_call_operand.vmem [shape: f32[1,128], index: 4, kind: input, shape index: {}]   ;;  %s402_s5 = inlined_call_operand.hbm [shape: f32[128,128], index: 5, kind: input, shape index: {}]   ;;  %s403_s6 = inlined_call_operand.vmem [shape: f32[1,128], index: 6, kind: input, shape index: {}]   ;;  %s404_s7 = inlined_call_operand.hbm [shape: f32[8,128], index: 7, kind: output, shape index: {}]  }
   0x1   :  { %13 = vsyncpa [#allocation6], 0 }
   0x2   :  { %14 = vsyncpa [#allocation4], 0  ;;  %s36_s26 = sshll.u32 %s400_s3, 4  ;;  %s327_s27 = smov [#allocation5]   ;;  %s37_s26 = int_to_ptr.hbm [resolvable:$true] %s36_s26 }
   0x3   :  { %s38_s28 = sshll.u32 %s327_s27, 4  ;;  %s21_s8 = sshll.u32 %s398_s1, 4  ;;  %s39_s28 = int_to_ptr.vmem [resolvable:$true] %s38_s28  ;;  %s22_s8 = int_to_ptr.hbm [resolvable:$true] %s21_s8 }
   0x4   :  { %s328_s9 = smov 128   ;;  %s329_s10 = smov 8  }
   0x5   :  { %44 = dma.hbm_to_vmem [thread:$0]  %s37_s26, 2048, %s39_s28, [#allocation6], %s328_s9, %s328_s9, %s329_s10  }
   0x6   :  { %s330_s11 = smov [#allocation2]   ;;  %s51_s15 = sshll.u32 %s402_s5, 4  ;;  %s52_s15 = int_to_ptr.hbm [resolvable:$true] %s51_s15 }
   0x7   :  { %s23_s12 = sshll.u32 %s330_s11, 4  ;;  %s331_s3 = smov [#allocation7]   ;;  %s24_s12 = int_to_ptr.vmem [resolvable:$true] %s23_s12 }
   0x8   :  { %29 = dma.hbm_to_vmem [thread:$0]  %s22_s8, 2048, %s24_s12, [#allocation3], %s328_s9, %s328_s9, %s329_s10  }
   0x9   :  { %s53_s16 = sshll.u32 %s331_s3, 4  ;;  %s54_s16 = int_to_ptr.vmem [resolvable:$true] %s53_s16 }
   0xa   :  { %59 = dma.hbm_to_vmem [thread:$0]  %s52_s15, 2048, %s54_s16, [#allocation6], %s328_s9, %s328_s9, %s329_s10  }
   0xb   :  { %321 = dma.done.wait [#allocation3], 2048  }
   0xc   :  { %322 = vsyncadd [#allocation3], 4294965248 }
   0xd   :  { %323 = dma.done.wait [#allocation6], 4096  }
   0xe   :  { %324 = vsyncadd [#allocation6], 4294963200  ;;  %v90_v0 = vld [vmem:[#allocation2 + $0x78] sm:$0xff]  ;;  %v89_v1 = vld [vmem:[#allocation2 + $0x70] sm:$0xff]  ;;  %s332_s21 = smov [#allocation8]   ;;  %s205_s25 = sshll.u32 %s404_s7, 4  ;;  %s206_s25 = int_to_ptr.hbm [resolvable:$true] %s205_s25 }
   0xf   :  { %95 = vmatpush.msra.mxu0 %v90_v0  ;;  %v88_v2 = vld [vmem:[#allocation2 + $0x68] sm:$0xff]  ;;  %v87_v3 = vld [vmem:[#allocation2 + $0x60] sm:$0xff]  ;;  %v131_v4 = vld [vmem:[#allocation5 + $0x78] sm:$0xff]  ;;  %s203_s22 = sshll.u32 %s332_s21, 4  ;;  %s204_s22 = int_to_ptr.vmem [resolvable:$true] %s203_s22 }
  0x10   :  { %v86_v5 = vld [vmem:[#allocation2 + $0x58] sm:$0xff]  ;;  %136 = vmatpush.msra.mxu1 %v131_v4  ;;  %v130_v6 = vld [vmem:[#allocation5 + $0x70] sm:$0xff]  ;;  %v129_v7 = vld [vmem:[#allocation5 + $0x68] sm:$0xff] }
  0x11   :  { %96 = vmatpush.msra.mxu0 %v89_v1  ;;  %v85_v8 = vld [vmem:[#allocation2 + $0x50] sm:$0xff]  ;;  %v128_v9 = vld [vmem:[#allocation5 + $0x60] sm:$0xff]  ;;  %v84_v10 = vld [vmem:[#allocation2 + $0x48] sm:$0xff] }
  0x12   :  { %137 = vmatpush.msra.mxu1 %v130_v6  ;;  %v127_v11 = vld [vmem:[#allocation5 + $0x58] sm:$0xff]  ;;  %v83_v12 = vld [vmem:[#allocation2 + $0x40] sm:$0xff]  ;;  %v126_v13 = vld [vmem:[#allocation5 + $0x50] sm:$0xff] }
  0x13   :  { %97 = vmatpush.msra.mxu0 %v88_v2  ;;  %v82_v14 = vld [vmem:[#allocation2 + $0x38] sm:$0xff]  ;;  %v125_v15 = vld [vmem:[#allocation5 + $0x48] sm:$0xff]  ;;  %v81_v16 = vld [vmem:[#allocation2 + $0x30] sm:$0xff] }
  0x14   :  { %138 = vmatpush.msra.mxu1 %v129_v7  ;;  %v124_v17 = vld [vmem:[#allocation5 + $0x40] sm:$0xff]  ;;  %v80_v18 = vld [vmem:[#allocation2 + $0x28] sm:$0xff]  ;;  %v123_v19 = vld [vmem:[#allocation5 + $0x38] sm:$0xff] }
  0x15   :  { %98 = vmatpush.msra.mxu0 %v87_v3  ;;  %v79_v20 = vld [vmem:[#allocation2 + $0x20] sm:$0xff]  ;;  %v122_v21 = vld [vmem:[#allocation5 + $0x30] sm:$0xff]  ;;  %v78_v22 = vld [vmem:[#allocation2 + $0x18] sm:$0xff] }
  0x16   :  { %139 = vmatpush.msra.mxu1 %v128_v9  ;;  %v121_v23 = vld [vmem:[#allocation5 + $0x28] sm:$0xff]  ;;  %v77_v24 = vld [vmem:[#allocation2 + $0x10] sm:$0xff]  ;;  %v120_v25 = vld [vmem:[#allocation5 + $0x20] sm:$0xff] }
  0x17   :  { %99 = vmatpush.msra.mxu0 %v86_v5  ;;  %v76_v26 = vld [vmem:[#allocation2 + $0x8] sm:$0xff]  ;;  %v119_v27 = vld [vmem:[#allocation5 + $0x18] sm:$0xff]  ;;  %v75_v28 = vld [vmem:[#allocation2] sm:$0xff] }
  0x18   :  { %140 = vmatpush.msra.mxu1 %v127_v11  ;;  %v74_v29 = vld [vmem:[%s397_s0] sm:$0xff]  ;;  %v118_v30 = vld [vmem:[#allocation5 + $0x10] sm:$0xff]  ;;  %v117_v31 = vld [vmem:[#allocation5 + $0x8] sm:$0xff] }
  0x19   :  { %100 = vmatpush.msra.mxu0 %v85_v8  ;;  %v116_v32 = vld [vmem:[#allocation5] sm:$0xff]  ;;  %v172_v33 = vld [vmem:[#allocation7 + $0x78] sm:$0xff]  ;;  %v171_v34 = vld [vmem:[#allocation7 + $0x70] sm:$0xff] }
  0x1a   :  { %141 = vmatpush.msra.mxu1 %v126_v13  ;;  %177 = vmatpush.msra.mxu2 %v172_v33  ;;  %v170_v35 = vld [vmem:[#allocation7 + $0x68] sm:$0xff]  ;;  %v169_v36 = vld [vmem:[#allocation7 + $0x60] sm:$0xff]  ;;  %v168_v37 = vld [vmem:[#allocation7 + $0x58] sm:$0xff] }
  0x1b   :  { %101 = vmatpush.msra.mxu0 %v84_v10  ;;  %v167_v38 = vld [vmem:[#allocation7 + $0x50] sm:$0xff]  ;;  %v166_v39 = vld [vmem:[#allocation7 + $0x48] sm:$0xff]  ;;  %v165_v40 = vld [vmem:[#allocation7 + $0x40] sm:$0xff] }
  0x1c   :  { %142 = vmatpush.msra.mxu1 %v125_v15  ;;  %178 = vmatpush.msra.mxu2 %v171_v34  ;;  %v164_v41 = vld [vmem:[#allocation7 + $0x38] sm:$0xff]  ;;  %v163_v42 = vld [vmem:[#allocation7 + $0x30] sm:$0xff]  ;;  %v162_v43 = vld [vmem:[#allocation7 + $0x28] sm:$0xff] }
  0x1d   :  { %102 = vmatpush.msra.mxu0 %v83_v12  ;;  %v161_v44 = vld [vmem:[#allocation7 + $0x20] sm:$0xff]  ;;  %v160_v45 = vld [vmem:[#allocation7 + $0x18] sm:$0xff]  ;;  %v159_v50 = vld [vmem:[#allocation7 + $0x10] sm:$0xff] }
  0x1e   :  { %143 = vmatpush.msra.mxu1 %v124_v17  ;;  %179 = vmatpush.msra.mxu2 %v170_v35  ;;  %v222_v46 = vld [vmem:[%s399_s2] ss:$0 sm:$0xff]  ;;  %v158_v51 = vld [vmem:[#allocation7 + $0x8] sm:$0xff] }
  0x1f   :  { %103 = vmatpush.msra.mxu0 %v82_v14  ;;  %v157_v52 = vld [vmem:[#allocation7] sm:$0xff] }
  0x20   :  { %144 = vmatpush.msra.mxu1 %v123_v19  ;;  %180 = vmatpush.msra.mxu2 %v169_v36  ;;  %v223_v53 = vld [vmem:[%s401_s4] ss:$0 sm:$0xff] }
  0x21   :  { %104 = vmatpush.msra.mxu0 %v81_v16  ;;  %v224_v57 = vld [vmem:[%s403_s6] ss:$0 sm:$0xff] }
  0x22   :  { %145 = vmatpush.msra.mxu1 %v122_v21  ;;  %181 = vmatpush.msra.mxu2 %v168_v37 }
  0x23   :  { %105 = vmatpush.msra.mxu0 %v80_v18 }
  0x24   :  { %146 = vmatpush.msra.mxu1 %v121_v23  ;;  %182 = vmatpush.msra.mxu2 %v167_v38 }
  0x25   :  { %106 = vmatpush.msra.mxu0 %v79_v20 }
  0x26   :  { %147 = vmatpush.msra.mxu1 %v120_v25  ;;  %183 = vmatpush.msra.mxu2 %v166_v39 }
  0x27   :  { %107 = vmatpush.msra.mxu0 %v78_v22 }
  0x28   :  { %148 = vmatpush.msra.mxu1 %v119_v27  ;;  %184 = vmatpush.msra.mxu2 %v165_v40 }
  0x29   :  { %108 = vmatpush.msra.mxu0 %v77_v24 }
  0x2a   :  { %149 = vmatpush.msra.mxu1 %v118_v30  ;;  %185 = vmatpush.msra.mxu2 %v164_v41 }
  0x2b   :  { %109 = vmatpush.msra.mxu0 %v76_v26 }
  0x2c   :  { %150 = vmatpush.msra.mxu1 %v117_v31  ;;  %186 = vmatpush.msra.mxu2 %v163_v42 }
  0x2d   :  { %110 = vmatpush.msra.mxu0 %v75_v28 }
  0x2e   :  { %111 = vmatmul.f32.vlgmr.msra.gmra.mxu0 %v74_v29  ;;  %151 = vmatpush.msra.mxu1 %v116_v32 }
  0x2f   :  { %187 = vmatpush.msra.mxu2 %v162_v43 }
  0x31   :  { %188 = vmatpush.msra.mxu2 %v161_v44 }
  0x33   :  { %189 = vmatpush.msra.mxu2 %v160_v45 }
  0x35   :  { %190 = vmatpush.msra.mxu2 %v159_v50 }
  0x37   :  { %191 = vmatpush.msra.mxu2 %v158_v51 }
  0x39   :  { %192 = vmatpush.msra.mxu2 %v157_v52 }
  0xab   :  { %v112_v47 = vpop.f32.mrf.mxu0 }
  0xac   :  { %v113_v48 = vadd.f32 %v222_v46, %v112_v47 }
  0xae   :  { %v115_v49 = vmax.f32 %v113_v48, 0.0 }
  0xb0   :  { %152 = vmatmul.f32.vlgmr.msra.gmra.mxu1 %v115_v49 }
 0x12d   :  { %v153_v54 = vpop.f32.mrf.mxu1 }
 0x12e   :  { %v154_v55 = vadd.f32 %v223_v53, %v153_v54 }
 0x130   :  { %v156_v56 = vmax.f32 %v154_v55, 0.0 }
 0x132   :  { %193 = vmatmul.f32.vlgmr.msra.gmra.mxu2 %v156_v56 }
 0x1b5   :  { %v194_v58 = vpop.f32.mrf.mxu2 }
 0x1b6   :  { %v195_v59 = vadd.f32 %v224_v57, %v194_v58 }
 0x1b8   :  { %197 = vst [vmem:[#allocation8] sm:$0xff] %v195_v59 }
 0x1b9   :  { %208 = dma.vmem_to_hbm [thread:$0]  %s204_s22, 128, %s206_s25, [#allocation4]  }
 0x1ba   :  { %325 = dma.done.wait [#allocation4], 128  }
 0x1bb   :  { %326 = vsyncadd [#allocation4], 4294967168 }
 0x1bc   :  { %213 = vsyncpa [#allocation3], 1 }
 0x1bd   :  { %214 = vsyncpa [#allocation6], 1 }
 0x1be   :  { %215 = vsyncpa [#allocation4], 1 }

</bundles_post_ra>
